<compile_context>
chip_gen: v6e
topology: v6e:2x2x1
jax: 0.10.0
libtpu: 0.0.40
codegen_flags: <defaults>
</compile_context>

<pallas_src>
import jax
import jax.numpy as jnp
from jax.experimental import pallas as pl
from jax.experimental.pallas import tpu as pltpu

_TARGET_TILE_BYTES = 2 * 1024 * 1024   # per-input VMEM buffer per grid step


def _make_kernel(row_tile, n_rows, ragged):
    def kernel(mel_ref, mel_tgt_ref, dur_ref, dur_tgt_ref, out_ref):
        i = pl.program_id(0)

        @pl.when(i == 0)
        def _init():
            out_ref[0, 0] = jnp.float32(0.0)
            out_ref[0, 1] = jnp.float32(0.0)

        # Hot path: elementwise VPU work on the current (row_tile, C) slab.
        diff = jnp.abs(mel_ref[...].astype(jnp.float32)
                       - mel_tgt_ref[...].astype(jnp.float32))
        if ragged:
            # Only the last block contains padded (undefined) tail rows; the
            # mask is cheap and correct on every step (n_rows is baked in).
            row = jax.lax.broadcasted_iota(jnp.int32, diff.shape, 0)
            valid = (i * row_tile + row) < n_rows
            diff = jnp.where(valid, diff, jnp.float32(0.0))

        # Per-step reduce, accumulated in the resident SMEM output block.
        # (Hidden under the per-step HBM DMA on every TPU generation.)
        out_ref[0, 0] += jnp.sum(diff)

        @pl.when(i == pl.num_programs(0) - 1)
        def _finalize():
            d = (dur_ref[...].astype(jnp.float32)
                 - dur_tgt_ref[...].astype(jnp.float32))
            out_ref[0, 1] = jnp.sum(d * d)

    return kernel


def fastspeech_loss(mel, duration_predicted, mel_target, duration_predictor_target):
    """Returns (mel_loss, duration_predictor_loss) as scalar float32 arrays."""
    assert mel.shape == mel_target.shape
    assert duration_predicted.shape == duration_predictor_target.shape

    n_mel = mel.size
    n_dur = duration_predicted.size

    # ---- free (rows, C) view of mel / mel_target; no padding copy ----
    C = mel.shape[-1]
    n_rows = n_mel // C
    mel2 = mel.reshape(n_rows, C)
    mel_tgt2 = mel_target.reshape(n_rows, C)

    # Durations as tiny 2-D (1, L) resident blocks (avoids 1-D layout quirks).
    dur2 = duration_predicted.reshape(1, n_dur)
    dur_tgt2 = duration_predictor_target.reshape(1, n_dur)

    # ---- dtype-aware tile sizing ----
    itemsize = jnp.dtype(mel.dtype).itemsize
    sub_mult = 8 * max(1, 4 // itemsize)              # 8 f32, 16 bf16, 32 int8
    lanes = ((C + 127) // 128) * 128                  # VMEM lane padding
    vmem_row_bytes = lanes * itemsize
    max_rows = max(sub_mult,
                   (_TARGET_TILE_BYTES // vmem_row_bytes) // sub_mult * sub_mult)
    rows_needed = ((n_rows + sub_mult - 1) // sub_mult) * sub_mult
    row_tile = min(max_rows, rows_needed)
    steps = pl.cdiv(n_rows, row_tile)
    ragged = (n_rows % row_tile) != 0

    kernel = _make_kernel(row_tile, n_rows, ragged)

    mel_map = lambda i: (i, 0)
    const_map = lambda i: (0, 0)

    partials = pl.pallas_call(
        kernel,
        out_shape=jax.ShapeDtypeStruct((1, 2), jnp.float32),
        grid_spec=pltpu.PrefetchScalarGridSpec(
            num_scalar_prefetch=0,
            grid=(steps,),
            in_specs=[
                pl.BlockSpec((row_tile, C), mel_map),        # mel
                pl.BlockSpec((row_tile, C), mel_map),        # mel_target
                pl.BlockSpec((1, n_dur), const_map),         # dur pred (resident)
                pl.BlockSpec((1, n_dur), const_map),         # dur target (resident)
            ],
            out_specs=pl.BlockSpec((1, 2), const_map,
                                   memory_space=pltpu.MemorySpace.SMEM),
        ),
        compiler_params=pltpu.CompilerParams(
            dimension_semantics=("arbitrary",)),
    )(mel2, mel_tgt2, dur2, dur_tgt2)

    mel_loss = partials[0, 0] * (1.0 / float(n_mel))
    dur_loss = partials[0, 1] * (1.0 / float(n_dur))
    return mel_loss, dur_loss


def _reference(mel, dur, mel_tgt, dur_tgt):
    ref_mel = jnp.mean(jnp.abs(mel - mel_tgt))
    ref_dur = jnp.mean((dur - dur_tgt.astype(jnp.float32)) ** 2)
    return ref_mel, ref_dur


if __name__ == "__main__":
    key = jax.random.PRNGKey(0)
    k1, k2, k3, k4 = jax.random.split(key, 4)

    # Case 1: exact tiling (rows = 16).
    B, T, N_MELS = 2, 8, 32
    mel = jax.random.normal(k1, (B, T, N_MELS), dtype=jnp.float32)
    mel_target = jax.random.normal(k2, (B, T, N_MELS), dtype=jnp.float32)
    duration_predicted = jax.random.normal(k3, (B, T), dtype=jnp.float32)
    duration_predictor_target = jax.random.randint(k4, (B, T), 0, 10, dtype=jnp.int32)

    mel_loss, dur_loss = fastspeech_loss(
        mel, duration_predicted, mel_target, duration_predictor_target)
    jax.block_until_ready((mel_loss, dur_loss))

    ref_mel, ref_dur = _reference(mel, duration_predicted, mel_target,
                                  duration_predictor_target)
    assert jnp.allclose(mel_loss, ref_mel, rtol=1e-5, atol=1e-6)
    assert jnp.allclose(dur_loss, ref_dur, rtol=1e-5, atol=1e-6)

    # Case 2: ragged rows (15 rows -> padded tail block, exercises the mask).
    k5, k6, k7, k8 = jax.random.split(k4, 4)
    B2, T2, M2 = 3, 5, 40
    mel_b = jax.random.normal(k5, (B2, T2, M2), dtype=jnp.float32)
    mel_tgt_b = jax.random.normal(k6, (B2, T2, M2), dtype=jnp.float32)
    dur_b = jax.random.normal(k7, (B2, T2), dtype=jnp.float32)
    dur_tgt_b = jax.random.randint(k8, (B2, T2), 0, 10, dtype=jnp.int32)

    mel_loss_b, dur_loss_b = fastspeech_loss(mel_b, dur_b, mel_tgt_b, dur_tgt_b)
    jax.block_until_ready((mel_loss_b, dur_loss_b))

    ref_mel_b, ref_dur_b = _reference(mel_b, dur_b, mel_tgt_b, dur_tgt_b)
    assert jnp.allclose(mel_loss_b, ref_mel_b, rtol=1e-5, atol=1e-6)
    assert jnp.allclose(dur_loss_b, ref_dur_b, rtol=1e-5, atol=1e-6)

    print("KERNEL_OK")
</pallas_src>

<mosaic_0001>
module attributes {stable_mosaic.version = 11 : i64} {
  func.func @kernel(%arg0: i32, %arg1: memref<16x32xf32, #tpu.memory_space<vmem>>, %arg2: memref<16x32xf32, #tpu.memory_space<vmem>>, %arg3: memref<1x16xf32, #tpu.memory_space<vmem>>, %arg4: memref<1x16xi32, #tpu.memory_space<vmem>>, %arg5: memref<1x2xf32, #tpu.memory_space<smem>>) attributes {dimension_semantics = [#tpu.dimension_semantics<arbitrary>], iteration_bounds = array<i64: 1>, scalar_prefetch = 0 : i64, scratch_operands = 0 : i64, tpu.core_type = #tpu.core_type<tc>, window_params = [{transform_indices = @transform_0, window_bounds = array<i64: 16, 32>}, {transform_indices = @transform_1, window_bounds = array<i64: 16, 32>}, {pipeline_mode = #tpu.pipeline_mode<synchronous>, transform_indices = @transform_2, window_bounds = array<i64: 1, 16>}, {pipeline_mode = #tpu.pipeline_mode<synchronous>, transform_indices = @transform_3, window_bounds = array<i64: 1, 16>}, {transform_indices = @transform_4, window_bounds = array<i64: 1, 2>}]} {
    %c0_i32 = arith.constant 0 : i32
    %0 = arith.cmpi eq, %arg0, %c0_i32 : i32
    %1 = arith.extui %0 : i1 to i32
    %c0_i32_0 = arith.constant 0 : i32
    %2 = arith.cmpi ne, %1, %c0_i32_0 : i32
    scf.if %2 {
      %cst_10 = arith.constant 0.000000e+00 : f32
      %c0_11 = arith.constant 0 : index
      %c0_12 = arith.constant 0 : index
      %17 = memref.load %arg5[%c0_11, %c0_12] : memref<1x2xf32, #tpu.memory_space<smem>>
      memref.store %cst_10, %arg5[%c0_11, %c0_12] : memref<1x2xf32, #tpu.memory_space<smem>>
      %cst_13 = arith.constant 0.000000e+00 : f32
      %c0_14 = arith.constant 0 : index
      %c1 = arith.constant 1 : index
      %18 = memref.load %arg5[%c0_14, %c1] : memref<1x2xf32, #tpu.memory_space<smem>>
      memref.store %cst_13, %arg5[%c0_14, %c1] : memref<1x2xf32, #tpu.memory_space<smem>>
    } else {
    }
    %c0 = arith.constant 0 : index
    %c0_1 = arith.constant 0 : index
    %3 = vector.load %arg1[%c0, %c0_1] : memref<16x32xf32, #tpu.memory_space<vmem>>, vector<16x32xf32>
    %c0_2 = arith.constant 0 : index
    %c0_3 = arith.constant 0 : index
    %4 = vector.load %arg2[%c0_2, %c0_3] : memref<16x32xf32, #tpu.memory_space<vmem>>, vector<16x32xf32>
    %5 = arith.subf %3, %4 : vector<16x32xf32>
    %6 = math.absf %5 : vector<16x32xf32>
    %c0_4 = arith.constant 0 : index
    %c0_5 = arith.constant 0 : index
    %7 = memref.load %arg5[%c0_4, %c0_5] : memref<1x2xf32, #tpu.memory_space<smem>>
    %8 = vector.shape_cast %6 : vector<16x32xf32> to vector<1x16x32xf32>
    %cst = arith.constant dense<0.000000e+00> : vector<1xf32>
    %9 = vector.multi_reduction <add>, %8, %cst [1, 2] : vector<1x16x32xf32> to vector<1xf32>
    %10 = vector.shape_cast %9 : vector<1xf32> to vector<1x1x1xf32>
    %11 = vector.extract %10[0, 0, 0] : f32 from vector<1x1x1xf32>
    %12 = arith.addf %7, %11 : f32
    %c0_6 = arith.constant 0 : index
    %c0_7 = arith.constant 0 : index
    %13 = memref.load %arg5[%c0_6, %c0_7] : memref<1x2xf32, #tpu.memory_space<smem>>
    memref.store %12, %arg5[%c0_6, %c0_7] : memref<1x2xf32, #tpu.memory_space<smem>>
    %c0_i32_8 = arith.constant 0 : i32
    %14 = arith.cmpi eq, %arg0, %c0_i32_8 : i32
    %15 = arith.extui %14 : i1 to i32
    %c0_i32_9 = arith.constant 0 : i32
    %16 = arith.cmpi ne, %15, %c0_i32_9 : i32
    scf.if %16 {
      %c0_10 = arith.constant 0 : index
      %c0_11 = arith.constant 0 : index
      %17 = vector.load %arg3[%c0_10, %c0_11] : memref<1x16xf32, #tpu.memory_space<vmem>>, vector<1x16xf32>
      %c0_12 = arith.constant 0 : index
      %c0_13 = arith.constant 0 : index
      %18 = vector.load %arg4[%c0_12, %c0_13] : memref<1x16xi32, #tpu.memory_space<vmem>>, vector<1x16xi32>
      %19 = arith.sitofp %18 : vector<1x16xi32> to vector<1x16xf32>
      %20 = arith.subf %17, %19 : vector<1x16xf32>
      %21 = arith.mulf %20, %20 : vector<1x16xf32>
      %22 = vector.shape_cast %21 : vector<1x16xf32> to vector<1x1x16xf32>
      %cst_14 = arith.constant dense<0.000000e+00> : vector<1xf32>
      %23 = vector.multi_reduction <add>, %22, %cst_14 [1, 2] : vector<1x1x16xf32> to vector<1xf32>
      %24 = vector.shape_cast %23 : vector<1xf32> to vector<1x1x1xf32>
      %25 = vector.extract %24[0, 0, 0] : f32 from vector<1x1x1xf32>
      %c0_15 = arith.constant 0 : index
      %c1 = arith.constant 1 : index
      %26 = memref.load %arg5[%c0_15, %c1] : memref<1x2xf32, #tpu.memory_space<smem>>
      memref.store %25, %arg5[%c0_15, %c1] : memref<1x2xf32, #tpu.memory_space<smem>>
    } else {
    }
    return
  }
  func.func @transform_0(%arg0: i32) -> (i32, i32) {
    %c0_i32 = arith.constant 0 : i32
    %c0_i32_0 = arith.constant 0 : i32
    return %arg0, %c0_i32 : i32, i32
  }
  func.func @transform_1(%arg0: i32) -> (i32, i32) {
    %c0_i32 = arith.constant 0 : i32
    %c0_i32_0 = arith.constant 0 : i32
    return %arg0, %c0_i32 : i32, i32
  }
  func.func @transform_2(%arg0: i32) -> (i32, i32) {
    %c0_i32 = arith.constant 0 : i32
    %c0_i32_0 = arith.constant 0 : i32
    %c0_i32_1 = arith.constant 0 : i32
    return %c0_i32, %c0_i32_0 : i32, i32
  }
  func.func @transform_3(%arg0: i32) -> (i32, i32) {
    %c0_i32 = arith.constant 0 : i32
    %c0_i32_0 = arith.constant 0 : i32
    %c0_i32_1 = arith.constant 0 : i32
    return %c0_i32, %c0_i32_0 : i32, i32
  }
  func.func @transform_4(%arg0: i32) -> (i32, i32) {
    %c0_i32 = arith.constant 0 : i32
    %c0_i32_0 = arith.constant 0 : i32
    %c0_i32_1 = arith.constant 0 : i32
    return %c0_i32, %c0_i32_0 : i32, i32
  }
}

</mosaic_0001>

<bundles_post_ra>
// kernel: tpu_custom_call.1
= control target key start
LH: loop header
LB: loop body
LE: loop exit
PB: predicated region body
PF: predicated region fallthrough
CT: control target
= control target key end

     0   :  { %9 = vsyncpa [#allocation3], 0  ;;  %s224_s0 = inlined_call_operand.hbm [shape: f32[16,32], index: 0, kind: input, shape index: {}]   ;;  %s225_s1 = inlined_call_operand.hbm [shape: f32[16,32], index: 1, kind: input, shape index: {}]   ;;  %s226_s2 = inlined_call_operand.vmem [shape: f32[1,16], index: 2, kind: input, shape index: {}]   ;;  %s227_s3 = inlined_call_operand.vmem [shape: s32[1,16], index: 3, kind: input, shape index: {}]   ;;  %s228_s4 = inlined_call_operand.hbm [shape: f32[1,2], index: 4, kind: output, shape index: {}]  }
   0x1   :  { %10 = vsyncpa [#allocation6], 0 }
   0x2   :  { %11 = vsyncpa [#allocation4], 0  ;;  %s179_s15 = smov [#allocation2]  }
   0x3   :  { %s17_s16 = sshll.u32 %s179_s15, 4  ;;  %s18_s16 = int_to_ptr.vmem [resolvable:$true] %s17_s16 }
   0x4   :  { %s133_s17 = scalar_lea.vmem %s18_s16, 256  ;;  %p138_p1 = scmp.lt.s32.totalorder %s18_s16, %s18_s16 }
   0x5   :  { %p134_p0 = scmp.ne.s32.totalorder %s18_s16, %s133_s17  ;;  %p139_p2 = scmp.lt.s32.totalorder %s133_s17, %s133_s17 }
   0x7   :  { %p140_p3 = por %p139_p2, %p138_p1 }
   0x9   :  { %p141_p4 = pnand %p140_p3, %p134_p0 }
   0xb   :  { %144 = shalt.err (!%p141_p4)
}
   0xc   :  { %s180_s18 = smov 128   ;;  %s181_s19 = smov 8  }
   0xd   :  { %23 = dma.hbm_to_vmem [thread:$0]  %s224_s0, 256, %s18_s16, [#allocation3], %s180_s18, %s180_s18, %s181_s19  }
   0xe   :  { %s182_s22 = smov [#allocation5]  }
   0xf   :  { %s29_s23 = sshll.u32 %s182_s22, 4  ;;  %s30_s23 = int_to_ptr.vmem [resolvable:$true] %s29_s23 }
  0x10   :  { %s153_s24 = scalar_lea.vmem %s30_s23, 256  ;;  %p158_p6 = scmp.lt.s32.totalorder %s30_s23, %s30_s23 }
  0x11   :  { %p154_p5 = scmp.ne.s32.totalorder %s30_s23, %s153_s24  ;;  %p159_p7 = scmp.lt.s32.totalorder %s153_s24, %s153_s24 }
  0x13   :  { %p160_p8 = por %p159_p7, %p158_p6 }
  0x15   :  { %p161_p9 = pnand %p160_p8, %p154_p5 }
  0x17   :  { %164 = shalt.err (!%p161_p9)
}
  0x18   :  { %35 = dma.hbm_to_vmem [thread:$0]  %s225_s1, 256, %s30_s23, [#allocation6], %s180_s18, %s180_s18, %s181_s19  }
  0x19   :  { %173 = dma.done.wait [#allocation3], 256  }
  0x1a   :  { %174 = vsyncadd [#allocation3], 4294967040 }
  0x1b   :  { %175 = dma.done.wait [#allocation6], 256  }
  0x1c   :  { %176 = vsyncadd [#allocation6], 4294967040  ;;  %v54_v0 = vld [vmem:[#allocation2] sm:$0xff]  ;;  %v55_v1 = vld [vmem:[#allocation2 + $0x8] sm:$0xff]  ;;  %vm63_vm0 = vcmask 261120   ;;  %vm87_vm1 = vcmask 122880  }
  0x1d   :  { %v56_v2 = vld [vmem:[#allocation5] sm:$0xff]  ;;  %v57_v3 = vld [vmem:[#allocation5 + $0x8] sm:$0xff]  ;;  %v82_v5 = vld [vmem:[%s226_s2] sm:$0x1] }
  0x1e   :  { %v58_v4 = vsub.f32 %v54_v0, %v56_v2  ;;  %v83_v6 = vld [vmem:[%s227_s3] sm:$0x1]  ;;  %v59_v7 = vsub.f32 %v55_v1, %v57_v3  ;;  %s183_s3 = smov [#allocation7]  }
  0x1f   :  { %v84_v8 = vcvt.s32.f32 %v83_v6 }
  0x20   :  { %v60_v9 = vand.u32 2147483647, %v58_v4  ;;  %v61_v10 = vand.u32 2147483647, %v59_v7 }
  0x21   :  { %v85_v11 = vsub.f32 %v82_v5, %v84_v8 }
  0x22   :  { %v64_v12 = vsel %vm63_vm0, %v60_v9, 0.0  ;;  %v65_v13 = vsel %vm63_vm0, %v61_v10, 0.0 }
  0x23   :  { %v86_v14 = vmul.f32 %v85_v11, %v85_v11  ;;  %v66_v15 = vadd.f32 %v65_v13, %v64_v12 }
  0x25   :  { %67 = vadd.xlane.f32.xlu0 %v66_v15  ;;  %v88_v16 = vsel %vm87_vm1, %v86_v14, 0.0 }
  0x29   :  { %89 = vadd.xlane.f32.xlu0 %v88_v16 }
  0xae   :  { %v68_v17 = vpop.xlane.xlu0 %67 }
  0xaf   :  { %v69_v18 = vrot.slane %v68_v17, 4 }
  0xb1   :  { %v70_v19 = vadd.f32 %v69_v18, %v68_v17 }
  0xb2   :  { %v90_v20 = vpop.xlane.xlu0 %89 }
  0xb3   :  { %v71_v21 = vrot.slane %v70_v19, 2  ;;  %v91_v22 = vrot.slane %v90_v20, 4 }
  0xb5   :  { %v92_v23 = vadd.f32 %v91_v22, %v90_v20  ;;  %v72_v24 = vadd.f32 %v71_v21, %v70_v19 }
  0xb7   :  { %v93_v25 = vrot.slane %v92_v23, 2  ;;  %v73_v26 = vrot.slane %v72_v24, 1 }
  0xb9   :  { %v94_v27 = vadd.f32 %v93_v25, %v92_v23  ;;  %v74_v28 = vadd.f32 %v73_v26, %v72_v24 }
  0xbb   :  { %115 = vpush %v74_v28  ;;  %v95_v29 = vrot.slane %v94_v27, 1 }
  0xbd   :  { %v96_v30 = vadd.f32 %v95_v29, %v94_v27 }
  0xbf   :  { %117 = vpush %v96_v30 }
  0xec   :  { %s116_s1 = spop %115 }
  0xed   :  { %78 = sst [smem:[#allocation7]] %s116_s1 }
  0xf0   :  { %s118_s2 = spop %117 }
  0xf1   :  { %99 = sst [smem:[#allocation7 + $0x1]] %s118_s2 }
  0xf2   :  { %107 = dma.smem_to_hbm %s183_s3, 16, %s228_s4, [#allocation4]  }
  0xf3   :  { %177 = dma.done.wait [#allocation4], 16  }
  0xf4   :  { %178 = vsyncadd [#allocation4], 4294967280 }
  0xf5   :  { %111 = sfence }
  0xf6   :  { %112 = vsyncpa [#allocation3], 1 }
  0xf7   :  { %113 = vsyncpa [#allocation6], 1 }
  0xf8   :  { %114 = vsyncpa [#allocation4], 1 }

</bundles_post_ra>
